<compile_context>
chip_gen: v6e
topology: v6e:2x2x1
jax: 0.10.0
libtpu: 0.0.40
codegen_flags: <defaults>
</compile_context>

<pallas_src>
import numpy as np
import jax
import jax.numpy as jnp
from jax.experimental import pallas as pl
from jax.experimental.pallas import tpu as pltpu

# KarateClub-like sizes
N_NODES = 34       # number of graph nodes
N_FEATURES = 34    # dataset.num_features (one-hot node id)
N_CLASSES = 4      # dataset.num_classes
H1, H2, H3 = 4, 4, 2

# Padded geometry
NP = 40            # node dim padded to a sublane multiple (8)
LP = 128           # lane width of the packed slab and of the output

# Row offsets inside the single packed input slab (all 8-aligned).
ROW_A = 0          # rows [0, 40)     lanes [0, NP)  : zero-padded A_hat
ROW_P1 = 40        # rows [40, 80)    lanes [0, H1)  : X @ W1 (== W1 when X = I)
ROW_B1 = 80        # row  80          lanes [0, H1)
ROW_W2 = 88        # rows [88, 92)    lanes [0, H2)
ROW_B2 = 96        # row  96          lanes [0, H2)
ROW_W3 = 104       # rows [104, 106)  lanes [0, H3)
ROW_B3 = 112       # row  112         lanes [0, H3)
ROW_WC = 120       # rows [120, 122)  lanes [0, LP)  : [Wc | I_H3 | 0]
ROW_BC = 128       # row  128         lanes [0, LP)  : [bc | 0]
ROWS_SLAB = 136    # multiple of 8


def gcn_kernel(slab_ref, out_ref):
    # Static, 8-aligned sublane slices of the single packed slab (free).
    a  = slab_ref[ROW_A:ROW_A + NP, 0:NP]            # [NP, NP] zero-padded A_hat
    p1 = slab_ref[ROW_P1:ROW_P1 + NP, 0:H1]          # [NP, H1] = X @ W1 (pre-folded)
    b1 = slab_ref[ROW_B1:ROW_B1 + 1, 0:H1]           # [1, H1]
    w2 = slab_ref[ROW_W2:ROW_W2 + H1, 0:H2]          # [H1, H2]
    b2 = slab_ref[ROW_B2:ROW_B2 + 1, 0:H2]           # [1, H2]
    w3 = slab_ref[ROW_W3:ROW_W3 + H2, 0:H3]          # [H2, H3]
    b3 = slab_ref[ROW_B3:ROW_B3 + 1, 0:H3]           # [1, H3]
    wc = slab_ref[ROW_WC:ROW_WC + H3, :]             # [H3, LP] = [Wc | I_H3 | 0]
    bc = slab_ref[ROW_BC:ROW_BC + 1, :]              # [1, LP]  = [bc | 0]

    # GCNConv 1 (MXU): tanh( A_hat @ (X @ W1) + b1 )
    h = jnp.tanh(jnp.dot(a, p1, preferred_element_type=jnp.float32) + b1)

    # GCNConv 2: h @ W2 as K=H1 rank-1 updates on the VPU, then A_hat matmul on MXU.
    t = h[:, 0:1] * w2[0:1, :]
    for k in range(1, H1):
        t = t + h[:, k:k + 1] * w2[k:k + 1, :]
    h = jnp.tanh(jnp.dot(a, t, preferred_element_type=jnp.float32) + b2)

    # GCNConv 3: h @ W3 as K=H2 rank-1 updates on the VPU, then A_hat matmul on MXU.
    t = h[:, 0:1] * w3[0:1, :]
    for k in range(1, H2):
        t = t + h[:, k:k + 1] * w3[k:k + 1, :]
    h = jnp.tanh(jnp.dot(a, t, preferred_element_type=jnp.float32) + b3)

    # Classifier + hidden emitted by ONE lane-dense MXU matmul + store:
    #   h @ [Wc | I | 0] + [bc | 0]  ->  lanes [0,C) = logits, lanes [C,C+H3) = h.
    out_ref[...] = jnp.dot(h, wc, preferred_element_type=jnp.float32) + bc


# ---------------------- host-side (once, outside jit) --------------------------

def normalized_adjacency_np(edge_index, n):
    """A_hat = D^-1/2 (A + I) D^-1/2 from a [2, E] edge_index. Pure numpy glue."""
    src = np.asarray(edge_index[0])
    dst = np.asarray(edge_index[1])
    adj = np.zeros((n, n), np.float32)
    adj[src, dst] = 1.0
    adj = np.maximum(adj, np.eye(n, dtype=np.float32))  # add self loops
    deg = adj.sum(axis=1)
    dinv = 1.0 / np.sqrt(deg)
    return adj * dinv[:, None] * dinv[None, :]


def build_slab(a_hat, params, x=None):
    """Pack A_hat + all layer params (plus folded X @ W1) into one [136, 128] slab.

    x=None means the node features are the identity (KarateClub one-hot ids), so the
    layer-1 pre-activation X @ W1 is just W1.  Built once on host with numpy.
    """
    w1, b1, w2, b2, w3, b3, wc, bc = [np.asarray(p, np.float32) for p in params]
    a_hat = np.asarray(a_hat, np.float32)
    n = a_hat.shape[0]
    p1 = w1 if x is None else np.asarray(x, np.float32) @ w1       # [N, H1]

    slab = np.zeros((ROWS_SLAB, LP), np.float32)                   # zero pad (exact)
    slab[ROW_A:ROW_A + n, :n] = a_hat
    slab[ROW_P1:ROW_P1 + p1.shape[0], :H1] = p1
    slab[ROW_B1, :H1] = b1.reshape(-1)
    slab[ROW_W2:ROW_W2 + H1, :H2] = w2
    slab[ROW_B2, :H2] = b2.reshape(-1)
    slab[ROW_W3:ROW_W3 + H2, :H3] = w3
    slab[ROW_B3, :H3] = b3.reshape(-1)
    # Classifier packed as [Wc | I_H3 | 0] so one matmul yields logits and h.
    slab[ROW_WC:ROW_WC + H3, :N_CLASSES] = wc
    slab[ROW_WC:ROW_WC + H3, N_CLASSES:N_CLASSES + H3] = np.eye(H3, dtype=np.float32)
    slab[ROW_BC, :N_CLASSES] = bc.reshape(-1)
    return jnp.asarray(slab)


def init_params(key):
    """Deterministic glorot-ish init for the 3 GCNConv layers + Linear."""
    ks = jax.random.split(key, 4)

    def glorot(k, fan_in, fan_out):
        lim = (6.0 / (fan_in + fan_out)) ** 0.5
        return jax.random.uniform(k, (fan_in, fan_out), jnp.float32, -lim, lim)

    w1 = glorot(ks[0], N_FEATURES, H1)
    w2 = glorot(ks[1], H1, H2)
    w3 = glorot(ks[2], H2, H3)
    wc = glorot(ks[3], H3, N_CLASSES)
    b1 = jnp.zeros((1, H1), jnp.float32)
    b2 = jnp.zeros((1, H2), jnp.float32)
    b3 = jnp.zeros((1, H3), jnp.float32)
    bc = jnp.zeros((1, N_CLASSES), jnp.float32)
    return (w1, b1, w2, b2, w3, b3, wc, bc)


# ---------------------------- jitted hot path -----------------------------------

@jax.jit
def gcn_forward(slab):
    """Forward pass: one gridless pallas_call on the pre-packed slab."""
    vmem = pl.BlockSpec(memory_space=pltpu.MemorySpace.VMEM)
    cost = pl.CostEstimate(
        flops=2 * (NP * NP * (H1 + H2 + H3)
                   + NP * (H1 * H2 + H2 * H3 + H3 * LP)),
        transcendentals=NP * (H1 + H2 + H3),
        bytes_accessed=4 * (ROWS_SLAB * LP + NP * LP),
    )
    res = pl.pallas_call(
        gcn_kernel,
        in_specs=[vmem],
        out_specs=vmem,
        out_shape=jax.ShapeDtypeStruct((NP, LP), jnp.float32),
        cost_estimate=cost,
    )(slab)
    out = res[:N_NODES, :N_CLASSES]
    h = res[:N_NODES, N_CLASSES:N_CLASSES + H3]
    return out, h


def gcn_forward_ref(x, a_hat, params):
    """Pure-JAX reference for correctness check."""
    w1, b1, w2, b2, w3, b3, wc, bc = params
    h = jnp.tanh(a_hat @ (x @ w1) + b1)
    h = jnp.tanh(a_hat @ (h @ w2) + b2)
    h = jnp.tanh(a_hat @ (h @ w3) + b3)
    return h @ wc + bc, h


if __name__ == "__main__":
    key = jax.random.PRNGKey(0)
    k_src, k_dst, k_params = jax.random.split(key, 3)

    # KarateClub node features are one-hot node ids: x = I_{34}
    x = jnp.eye(N_NODES, dtype=jnp.float32)

    # Deterministic synthetic undirected edge set (both directions stored).
    e_half = 78  # KarateClub has 78 undirected edges
    src = np.asarray(jax.random.randint(k_src, (e_half,), 0, N_NODES))
    dst = np.asarray(jax.random.randint(k_dst, (e_half,), 0, N_NODES))
    edge_index = np.stack([np.concatenate([src, dst]),
                           np.concatenate([dst, src])], axis=0).astype(np.int32)

    params = init_params(k_params)

    # Host-side, one-time prep (outside jit): adjacency + packed slab.
    a_hat = normalized_adjacency_np(edge_index, N_NODES)
    slab = build_slab(a_hat, params, x=None)   # x=None: features are the identity

    out, h = gcn_forward(slab)
    out = jax.block_until_ready(out)
    h = jax.block_until_ready(h)

    out_ref, h_ref = gcn_forward_ref(x, jnp.asarray(a_hat), params)
    assert out.shape == (N_NODES, N_CLASSES) and h.shape == (N_NODES, H3)
    assert jnp.allclose(out, out_ref, atol=1e-5, rtol=1e-5)
    assert jnp.allclose(h, h_ref, atol=1e-5, rtol=1e-5)

    print("KERNEL_OK")
</pallas_src>

<mosaic_0001>
module attributes {stable_mosaic.version = 11 : i64} {
  func.func @gcn_kernel(%arg0: memref<136x128xf32, #tpu.memory_space<vmem>>, %arg1: memref<40x128xf32, #tpu.memory_space<vmem>>) attributes {dimension_semantics = [], scalar_prefetch = 0 : i64, scratch_operands = 0 : i64, tpu.core_type = #tpu.core_type<tc>} {
    %c0 = arith.constant 0 : index
    %c0_0 = arith.constant 0 : index
    %0 = vector.load %arg0[%c0, %c0_0] : memref<136x128xf32, #tpu.memory_space<vmem>>, vector<40x40xf32>
    %c40 = arith.constant 40 : index
    %c0_1 = arith.constant 0 : index
    %1 = vector.load %arg0[%c40, %c0_1] : memref<136x128xf32, #tpu.memory_space<vmem>>, vector<40x4xf32>
    %c80 = arith.constant 80 : index
    %c0_2 = arith.constant 0 : index
    %2 = vector.load %arg0[%c80, %c0_2] : memref<136x128xf32, #tpu.memory_space<vmem>>, vector<1x4xf32>
    %c88 = arith.constant 88 : index
    %c0_3 = arith.constant 0 : index
    %3 = vector.load %arg0[%c88, %c0_3] : memref<136x128xf32, #tpu.memory_space<vmem>>, vector<4x4xf32>
    %c96 = arith.constant 96 : index
    %c0_4 = arith.constant 0 : index
    %4 = vector.load %arg0[%c96, %c0_4] : memref<136x128xf32, #tpu.memory_space<vmem>>, vector<1x4xf32>
    %c104 = arith.constant 104 : index
    %c0_5 = arith.constant 0 : index
    %5 = vector.load %arg0[%c104, %c0_5] : memref<136x128xf32, #tpu.memory_space<vmem>>, vector<4x2xf32>
    %c112 = arith.constant 112 : index
    %c0_6 = arith.constant 0 : index
    %6 = vector.load %arg0[%c112, %c0_6] : memref<136x128xf32, #tpu.memory_space<vmem>>, vector<1x2xf32>
    %c120 = arith.constant 120 : index
    %c0_7 = arith.constant 0 : index
    %7 = vector.load %arg0[%c120, %c0_7] : memref<136x128xf32, #tpu.memory_space<vmem>>, vector<2x128xf32>
    %c128 = arith.constant 128 : index
    %c0_8 = arith.constant 0 : index
    %8 = vector.load %arg0[%c128, %c0_8] : memref<136x128xf32, #tpu.memory_space<vmem>>, vector<1x128xf32>
    %cst = arith.constant dense<0.000000e+00> : vector<40x4xf32>
    %9 = tpu.matmul %0, %1, %cst {dimension_numbers = #tpu.dot_dimension_numbers<[1], [0], [0], [1], [0, 0, 1, 1], [], []>} : vector<40x40xf32>, vector<40x4xf32>, vector<40x4xf32> -> vector<40x4xf32>
    %10 = vector.broadcast %2 : vector<1x4xf32> to vector<40x4xf32>
    %11 = arith.addf %9, %10 : vector<40x4xf32>
    %12 = math.tanh %11 : vector<40x4xf32>
    %13 = vector.extract_strided_slice %12 {offsets = [0, 0], sizes = [40, 1], strides = [1, 1]} : vector<40x4xf32> to vector<40x1xf32>
    %14 = vector.extract_strided_slice %3 {offsets = [0, 0], sizes = [1, 4], strides = [1, 1]} : vector<4x4xf32> to vector<1x4xf32>
    %15 = vector.broadcast %13 : vector<40x1xf32> to vector<40x4xf32>
    %16 = vector.broadcast %14 : vector<1x4xf32> to vector<40x4xf32>
    %17 = arith.mulf %15, %16 : vector<40x4xf32>
    %18 = vector.extract_strided_slice %12 {offsets = [0, 1], sizes = [40, 1], strides = [1, 1]} : vector<40x4xf32> to vector<40x1xf32>
    %19 = vector.extract_strided_slice %3 {offsets = [1, 0], sizes = [1, 4], strides = [1, 1]} : vector<4x4xf32> to vector<1x4xf32>
    %20 = vector.broadcast %18 : vector<40x1xf32> to vector<40x4xf32>
    %21 = vector.broadcast %19 : vector<1x4xf32> to vector<40x4xf32>
    %22 = arith.mulf %20, %21 : vector<40x4xf32>
    %23 = arith.addf %17, %22 : vector<40x4xf32>
    %24 = vector.extract_strided_slice %12 {offsets = [0, 2], sizes = [40, 1], strides = [1, 1]} : vector<40x4xf32> to vector<40x1xf32>
    %25 = vector.extract_strided_slice %3 {offsets = [2, 0], sizes = [1, 4], strides = [1, 1]} : vector<4x4xf32> to vector<1x4xf32>
    %26 = vector.broadcast %24 : vector<40x1xf32> to vector<40x4xf32>
    %27 = vector.broadcast %25 : vector<1x4xf32> to vector<40x4xf32>
    %28 = arith.mulf %26, %27 : vector<40x4xf32>
    %29 = arith.addf %23, %28 : vector<40x4xf32>
    %30 = vector.extract_strided_slice %12 {offsets = [0, 3], sizes = [40, 1], strides = [1, 1]} : vector<40x4xf32> to vector<40x1xf32>
    %31 = vector.extract_strided_slice %3 {offsets = [3, 0], sizes = [1, 4], strides = [1, 1]} : vector<4x4xf32> to vector<1x4xf32>
    %32 = vector.broadcast %30 : vector<40x1xf32> to vector<40x4xf32>
    %33 = vector.broadcast %31 : vector<1x4xf32> to vector<40x4xf32>
    %34 = arith.mulf %32, %33 : vector<40x4xf32>
    %35 = arith.addf %29, %34 : vector<40x4xf32>
    %cst_9 = arith.constant dense<0.000000e+00> : vector<40x4xf32>
    %36 = tpu.matmul %0, %35, %cst_9 {dimension_numbers = #tpu.dot_dimension_numbers<[1], [0], [0], [1], [0, 0, 1, 1], [], []>} : vector<40x40xf32>, vector<40x4xf32>, vector<40x4xf32> -> vector<40x4xf32>
    %37 = vector.broadcast %4 : vector<1x4xf32> to vector<40x4xf32>
    %38 = arith.addf %36, %37 : vector<40x4xf32>
    %39 = math.tanh %38 : vector<40x4xf32>
    %40 = vector.extract_strided_slice %39 {offsets = [0, 0], sizes = [40, 1], strides = [1, 1]} : vector<40x4xf32> to vector<40x1xf32>
    %41 = vector.extract_strided_slice %5 {offsets = [0, 0], sizes = [1, 2], strides = [1, 1]} : vector<4x2xf32> to vector<1x2xf32>
    %42 = vector.broadcast %40 : vector<40x1xf32> to vector<40x2xf32>
    %43 = vector.broadcast %41 : vector<1x2xf32> to vector<40x2xf32>
    %44 = arith.mulf %42, %43 : vector<40x2xf32>
    %45 = vector.extract_strided_slice %39 {offsets = [0, 1], sizes = [40, 1], strides = [1, 1]} : vector<40x4xf32> to vector<40x1xf32>
    %46 = vector.extract_strided_slice %5 {offsets = [1, 0], sizes = [1, 2], strides = [1, 1]} : vector<4x2xf32> to vector<1x2xf32>
    %47 = vector.broadcast %45 : vector<40x1xf32> to vector<40x2xf32>
    %48 = vector.broadcast %46 : vector<1x2xf32> to vector<40x2xf32>
    %49 = arith.mulf %47, %48 : vector<40x2xf32>
    %50 = arith.addf %44, %49 : vector<40x2xf32>
    %51 = vector.extract_strided_slice %39 {offsets = [0, 2], sizes = [40, 1], strides = [1, 1]} : vector<40x4xf32> to vector<40x1xf32>
    %52 = vector.extract_strided_slice %5 {offsets = [2, 0], sizes = [1, 2], strides = [1, 1]} : vector<4x2xf32> to vector<1x2xf32>
    %53 = vector.broadcast %51 : vector<40x1xf32> to vector<40x2xf32>
    %54 = vector.broadcast %52 : vector<1x2xf32> to vector<40x2xf32>
    %55 = arith.mulf %53, %54 : vector<40x2xf32>
    %56 = arith.addf %50, %55 : vector<40x2xf32>
    %57 = vector.extract_strided_slice %39 {offsets = [0, 3], sizes = [40, 1], strides = [1, 1]} : vector<40x4xf32> to vector<40x1xf32>
    %58 = vector.extract_strided_slice %5 {offsets = [3, 0], sizes = [1, 2], strides = [1, 1]} : vector<4x2xf32> to vector<1x2xf32>
    %59 = vector.broadcast %57 : vector<40x1xf32> to vector<40x2xf32>
    %60 = vector.broadcast %58 : vector<1x2xf32> to vector<40x2xf32>
    %61 = arith.mulf %59, %60 : vector<40x2xf32>
    %62 = arith.addf %56, %61 : vector<40x2xf32>
    %cst_10 = arith.constant dense<0.000000e+00> : vector<40x2xf32>
    %63 = tpu.matmul %0, %62, %cst_10 {dimension_numbers = #tpu.dot_dimension_numbers<[1], [0], [0], [1], [0, 0, 1, 1], [], []>} : vector<40x40xf32>, vector<40x2xf32>, vector<40x2xf32> -> vector<40x2xf32>
    %64 = vector.broadcast %6 : vector<1x2xf32> to vector<40x2xf32>
    %65 = arith.addf %63, %64 : vector<40x2xf32>
    %66 = math.tanh %65 : vector<40x2xf32>
    %cst_11 = arith.constant dense<0.000000e+00> : vector<40x128xf32>
    %67 = tpu.matmul %66, %7, %cst_11 {dimension_numbers = #tpu.dot_dimension_numbers<[1], [0], [0], [1], [0, 0, 1, 1], [], []>} : vector<40x2xf32>, vector<2x128xf32>, vector<40x128xf32> -> vector<40x128xf32>
    %68 = vector.broadcast %8 : vector<1x128xf32> to vector<40x128xf32>
    %69 = arith.addf %67, %68 : vector<40x128xf32>
    %c0_12 = arith.constant 0 : index
    %c0_13 = arith.constant 0 : index
    %70 = vector.load %arg1[%c0_12, %c0_13] : memref<40x128xf32, #tpu.memory_space<vmem>>, vector<40x128xf32>
    tpu.vector_store %arg1[%c0_12, %c0_13], %69 {strides = array<i32>} : memref<40x128xf32, #tpu.memory_space<vmem>>, vector<40x128xf32>,
    return
  }
}

</mosaic_0001>

<bundles_post_ra>
// kernel: gcn_forward.1
= control target key start
LH: loop header
LB: loop body
LE: loop exit
PB: predicated region body
PF: predicated region fallthrough
CT: control target
= control target key end

     0   :  { %6 = vsyncpa [#allocation3], 0  ;;  %s995_s6 = smov [#allocation2]   ;;  %s1188_s0 = inlined_call_operand.hbm [shape: f32[136,128], index: 0, kind: input, shape index: {}]   ;;  %s1189_s1 = inlined_call_operand.vmem [shape: f32[40,128], index: 1, kind: output, shape index: {}]  }
   0x1   :  { %s12_s7 = sshll.u32 %s995_s6, 4  ;;  %s13_s7 = int_to_ptr.vmem [resolvable:$true] %s12_s7 }
   0x2   :  { %s981_s8 = scalar_lea.vmem %s13_s7, 2176  ;;  %p986_p1 = scmp.lt.s32.totalorder %s13_s7, %s13_s7 }
   0x3   :  { %p982_p0 = scmp.ne.s32.totalorder %s13_s7, %s981_s8  ;;  %p987_p2 = scmp.lt.s32.totalorder %s981_s8, %s981_s8 }
   0x5   :  { %p988_p3 = por %p987_p2, %p986_p1 }
   0x7   :  { %p989_p4 = pnand %p988_p3, %p982_p0 }
   0x9   :  { %992 = shalt.err (!%p989_p4)
}
   0xa   :  { %s996_s9 = smov 128   ;;  %s997_s10 = smov 8  }
   0xb   :  { %18 = dma.hbm_to_vmem [thread:$0]  %s1188_s0, 2176, %s13_s7, [#allocation3], %s996_s9, %s996_s9, %s997_s10  }
   0xc   :  { %993 = dma.done.wait [#allocation3], 2176  }
   0xd   :  { %994 = vsyncadd [#allocation3], 4294965120  ;;  %v998_v0 = vmov 0.0   ;;  %vm999_vm0 = vmmov 0   ;;  %v31_v1 = vld [vmem:[#allocation2 + $0x48] sm:$0xff]  ;;  %v30_v2 = vld [vmem:[#allocation2 + $0x40] sm:$0xff]  ;;  %v179_v44 = vlaneseq }
   0xe   :  { %809 = vmatprep.subr.mxu0 %v998_v0  ;;  %819 = vmatprep.mubr.msk.f32.mxu0 %vm999_vm0, %v998_v0  ;;  %v29_v3 = vld [vmem:[#allocation2 + $0x38] sm:$0xff]  ;;  %v28_v4 = vld [vmem:[#allocation2 + $0x30] sm:$0xff]  ;;  %v27_v5 = vld [vmem:[#allocation2 + $0x28] sm:$0xff]  ;;  %vm43_vm1 = vcmask 326656   ;;  %v1000_v11 = vmov 1   ;;  %v1001_v12 = vmov 0  }
   0xf   :  { %834 = vmatprep.subr.mxu1 %v998_v0  ;;  %844 = vmatprep.mubr.msk.f32.mxu1 %vm999_vm0, %v998_v0  ;;  %v1026_v6 = vld [vmem:[#allocation2] sm:$0xff]  ;;  %v1034_v7 = vld [vmem:[#allocation2 + $0x8] sm:$0xff]  ;;  %v1040_v8 = vld [vmem:[#allocation2 + $0x10] sm:$0xff]  ;;  %v1002_v32 = vmov 2   ;;  %v1003_v35 = vmov 3   ;;  %v1077_v47 = vshrl.u32 %v179_v44, 7 }
  0x10   :  { %810 = vmatpush3.msra.mxu0 %v31_v1  ;;  %v1046_v9 = vld [vmem:[#allocation2 + $0x18] sm:$0xff]  ;;  %v1052_v10 = vld [vmem:[#allocation2 + $0x20] sm:$0xff]  ;;  %911 = vset.pattern.permute.xlu0 %v1000_v11  ;;  %v748_v13 = vld [vmem:[#allocation2 + $0x50] ss:$0 sm:$0xff]  ;;  %vm644_vm2 = vcmask 1041408   ;;  %vm628_vm3 = vcmask 15360  }
  0x11   :  { %811 = vmatprep.subr.mxu0 %v998_v0  ;;  %910 = vset.pattern.permute.xlu1 %v1001_v12  ;;  %v210_v50 = vsub.s32 1, %v1077_v47  ;;  %v181_v51 = vsub.s32 0, %v1077_v47  ;;  %v33_v52 = vld [vmem:[#allocation2 + $0x58] sm:$0xf]  ;;  %v244_v55 = vsub.s32 2, %v1077_v47  ;;  %v278_v57 = vsub.s32 3, %v1077_v47 }
  0x12   :  { %812 = vmatpush3.msra.mxu0 %v30_v2 }
  0x13   :  { %813 = vmatprep.subr.mxu0 %v998_v0  ;;  %v211_v53 = vrot.slane %v33_v52, %v210_v50  ;;  %v182_v54 = vrot.slane %v33_v52, %v181_v51  ;;  %v245_v63 = vrot.slane %v33_v52, %v244_v55  ;;  %v279_v2 = vrot.slane %v33_v52, %v278_v57 }
  0x14   :  { %814 = vmatpush3.msra.mxu0 %v29_v3 }
  0x15   :  { %815 = vmatprep.subr.mxu0 %v998_v0 }
  0x16   :  { %816 = vmatpush3.msra.mxu0 %v28_v4 }
  0x17   :  { %817 = vmatprep.subr.mxu0 %v998_v0 }
  0x18   :  { %818 = vmatpush3.msra.mxu0 %v27_v5 }
  0x19   :  { %820 = vmatmul.mubr.msk.f32.vlgmr.msra.gmra.mxu0 %vm43_vm1, %v1026_v6  ;;  %859 = vmatprep.subr.mxu0 %v998_v0 }
  0x1a   :  { %822 = vmatprep.mubr.msk.f32.mxu0 %vm999_vm0, %v998_v0 }
  0x1d   :  { %823 = vmatmul.mubr.msk.f32.gmra.mxu0 %vm43_vm1, %v1034_v7 }
  0x1e   :  { %825 = vmatprep.mubr.msk.f32.mxu0 %vm999_vm0, %v998_v0 }
  0x21   :  { %826 = vmatmul.mubr.msk.f32.gmra.mxu0 %vm43_vm1, %v1040_v8 }
  0x22   :  { %828 = vmatprep.mubr.msk.f32.mxu0 %vm999_vm0, %v998_v0 }
  0x25   :  { %829 = vmatmul.mubr.msk.f32.gmra.mxu0 %vm43_vm1, %v1046_v9 }
  0x26   :  { %831 = vmatprep.mubr.msk.f32.mxu0 %vm999_vm0, %v998_v0 }
  0x29   :  { %832 = vmatmul.mubr.msk.f32.gmra.mxu0 %vm43_vm1, %v1052_v10 }
  0x2a   :  { %869 = vmatprep.mubr.msk.f32.mxu0 %vm999_vm0, %v998_v0 }
  0xd9   :  { %v125_v14 = vpop.f32.mrf.mxu0 }
  0xda   :  { %v126_v15 = vadd.f32 %v748_v13, %v125_v14 }
  0xdb   :  { %v821_v16 = vpop.f32.mrf.mxu0 }
  0xdc   :  { %943 = vtanh.f32 %v126_v15 }
  0xdd   :  { %v130_v17 = vpop.f32.mrf.mxu0 }
  0xde   :  { %v131_v18 = vadd.f32 %v748_v13, %v130_v17 }
  0xdf   :  { %v824_v19 = vpop.f32.mrf.mxu0 }
  0xe0   :  { %945 = vtanh.f32 %v131_v18 }
  0xe1   :  { %v135_v20 = vpop.f32.mrf.mxu0 }
  0xe2   :  { %v136_v21 = vadd.f32 %v748_v13, %v135_v20 }
  0xe3   :  { %v827_v22 = vpop.f32.mrf.mxu0 }
  0xe4   :  { %947 = vtanh.f32 %v136_v21 }
  0xe5   :  { %v140_v23 = vpop.f32.mrf.mxu0 }
  0xe6   :  { %v141_v30 = vadd.f32 %v748_v13, %v140_v23 }
  0xe7   :  { %v830_v24 = vpop.f32.mrf.mxu0 }
  0xe9   :  { %v944_v25 = vpop.eup %943  ;;  %v145_v26 = vpop.f32.mrf.mxu0 }
  0xea   :  { %189 = vperm.xlu0 %911, %v944_v25   ;;  %156 = vperm.xlu1 %910, %v944_v25   ;;  %v146_v27 = vadd.f32 %v748_v13, %v145_v26 }
  0xeb   :  { %v833_v28 = vpop.f32.mrf.mxu0 }
  0xec   :  { %949 = vtanh.f32 %v146_v27 }
  0xed   :  { %v946_v29 = vpop.eup %945  ;;  %951 = vtanh.f32 %v141_v30 }
  0xee   :  { %161 = vperm.xlu1 %910, %v946_v29   ;;  %914 = vset.pattern.permute.xlu0 %v1001_v12 }
  0xf1   :  { %v948_v31 = vpop.eup %947 }
  0xf2   :  { %912 = vset.pattern.permute.xlu1 %v1000_v11  ;;  %166 = vperm.xlu0 %914, %v948_v31  }
  0xf3   :  { %193 = vperm.xlu1 %912, %v946_v29  }
  0xf6   :  { %916 = vset.pattern.permute.xlu0 %v1002_v32 }
  0xf7   :  { %913 = vset.pattern.permute.xlu1 %v1002_v32  ;;  %231 = vperm.xlu0 %916, %v948_v31  }
  0xf8   :  { %227 = vperm.xlu1 %913, %v946_v29  }
  0xf9   :  { %v950_v33 = vpop.eup %949 }
  0xfa   :  { %v952_v34 = vpop.eup %951 }
  0xfb   :  { %921 = vset.pattern.permute.xlu0 %v1001_v12 }
  0xfc   :  { %915 = vset.pattern.permute.xlu1 %v1000_v11  ;;  %176 = vperm.xlu0 %921, %v950_v33  }
  0xfd   :  { %197 = vperm.xlu1 %915, %v948_v31  }
 0x100   :  { %922 = vset.pattern.permute.xlu0 %v1000_v11 }
 0x101   :  { %917 = vset.pattern.permute.xlu1 %v1001_v12  ;;  %205 = vperm.xlu0 %922, %v950_v33  }
 0x102   :  { %171 = vperm.xlu1 %917, %v952_v34  }
 0x105   :  { %925 = vset.pattern.permute.xlu0 %v1003_v35 }
 0x106   :  { %918 = vset.pattern.permute.xlu1 %v1000_v11  ;;  %273 = vperm.xlu0 %925, %v950_v33  }
 0x107   :  { %201 = vperm.xlu1 %918, %v952_v34  }
 0x10a   :  { %926 = vset.pattern.permute.xlu0 %v1002_v32 }
 0x10b   :  { %919 = vset.pattern.permute.xlu1 %v1002_v32  ;;  %223 = vperm.xlu0 %926, %v944_v25  }
 0x10c   :  { %235 = vperm.xlu1 %919, %v952_v34  }
 0x10f   :  { %928 = vset.pattern.permute.xlu0 %v1000_v11 }
 0x110   :  { %920 = vset.pattern.permute.xlu1 %v1003_v35 }
 0x111   :  { %269 = vperm.xlu1 %920, %v952_v34  }
 0x115   :  { %923 = vset.pattern.permute.xlu1 %v1002_v32 }
 0x116   :  { %239 = vperm.xlu1 %923, %v950_v33  }
 0x11a   :  { %924 = vset.pattern.permute.xlu1 %v1003_v35 }
 0x11b   :  { %265 = vperm.xlu1 %924, %v948_v31  }
 0x11f   :  { %261 = vperm.xlu1 %924, %v946_v29  }
 0x123   :  { %257 = vperm.xlu1 %924, %v944_v25  }
 0x127   :  { %927 = vset.pattern.permute.xlu1 %v1001_v12 }
 0x165   :  { %v157_v36 = vpop.permute.xlu1 %156  ;;  %v190_v40 = vpop.permute.xlu0 %189 }
 0x166   :  { %v212_v33 = vmul.f32 %v211_v53, %v190_v40  ;;  %v183_v34 = vmul.f32 %v182_v54, %v157_v36 }
 0x169   :  { %v162_v37 = vpop.permute.xlu1 %161 }
 0x16a   :  { %v184_v26 = vmul.f32 %v182_v54, %v162_v37  ;;  %v217_v37 = vadd.f32 %v212_v33, %v183_v34 }
 0x16d   :  { %v167_v42 = vpop.permute.xlu0 %166 }
 0x16e   :  { %v194_v38 = vpop.permute.xlu1 %193  ;;  %v185_v61 = vmul.f32 %v182_v54, %v167_v42 }
 0x16f   :  { %v213_v21 = vmul.f32 %v211_v53, %v194_v38 }
 0x172   :  { %v232_v45 = vpop.permute.xlu0 %231 }
 0x173   :  { %v228_v39 = vpop.permute.xlu1 %227  ;;  %v248_v22 = vmul.f32 %v245_v63, %v232_v45 }
 0x174   :  { %v247_v27 = vmul.f32 %v245_v63, %v228_v39 }
 0x177   :  { %v177_v48 = vpop.permute.xlu0 %176 }
 0x178   :  { %v198_v41 = vpop.permute.xlu1 %197  ;;  %v187_v59 = vmul.f32 %v182_v54, %v177_v48 }
 0x179   :  { %v214_v62 = vmul.f32 %v211_v53, %v198_v41  ;;  %v218_v41 = vadd.f32 %v213_v21, %v184_v26 }
 0x17b   :  { %v219_v16 = vadd.f32 %v214_v62, %v185_v61  ;;  %v252_v38 = vadd.f32 %v247_v27, %v218_v41 }
 0x17c   :  { %v206_v56 = vpop.permute.xlu0 %205 }
 0x17d   :  { %v172_v43 = vpop.permute.xlu1 %171  ;;  %v216_v60 = vmul.f32 %v211_v53, %v206_v56  ;;  %v253_v28 = vadd.f32 %v248_v22, %v219_v16 }
 0x17e   :  { %v186_v4 = vmul.f32 %v182_v54, %v172_v43 }
 0x17f   :  { %v221_v5 = vadd.f32 %v216_v60, %v187_v59 }
 0x181   :  { %v274_v13 = vpop.permute.xlu0 %273 }
 0x182   :  { %v202_v46 = vpop.permute.xlu1 %201  ;;  %v284_v18 = vmul.f32 %v279_v2, %v274_v13 }
 0x183   :  { %v215_v1 = vmul.f32 %v211_v53, %v202_v46 }
 0x185   :  { %v220_v17 = vadd.f32 %v215_v1, %v186_v4 }
 0x186   :  { %v224_v30 = vpop.permute.xlu0 %223 }
 0x187   :  { %v236_v49 = vpop.permute.xlu1 %235  ;;  %v246_v44 = vmul.f32 %v245_v63, %v224_v30 }
 0x188   :  { %v249_v14 = vmul.f32 %v245_v63, %v236_v49  ;;  %v754_v49 = vld [vmem:[#allocation2 + $0x60] ss:$0 sm:$0xff] }
 0x189   :  { %v251_v48 = vadd.f32 %v246_v44, %v217_v37 }
 0x18a   :  { %v254_v23 = vadd.f32 %v249_v14, %v220_v17 }
 0x18c   :  { %v270_v58 = vpop.permute.xlu1 %269 }
 0x18d   :  { %v283_v19 = vmul.f32 %v279_v2, %v270_v58 }
 0x18f   :  { %v288_v31 = vadd.f32 %v283_v19, %v254_v23 }
 0x191   :  { %v240_v3 = vpop.permute.xlu1 %239 }
 0x192   :  { %v250_v15 = vmul.f32 %v245_v63, %v240_v3 }
 0x194   :  { %v255_v20 = vadd.f32 %v250_v15, %v221_v5 }
 0x196   :  { %v266_v24 = vpop.permute.xlu1 %265  ;;  %v289_v25 = vadd.f32 %v284_v18, %v255_v20 }
 0x197   :  { %v282_v29 = vmul.f32 %v279_v2, %v266_v24 }
 0x198   :  { %835 = vmatpush3.msra.mxu1 %v289_v25 }
 0x199   :  { %v287_v42 = vadd.f32 %v282_v29, %v253_v28  ;;  %836 = vmatprep.subr.mxu1 %v998_v0  ;;  %v35_v28 = vld [vmem:[#allocation2 + $0x68] sm:$0xf] }
 0x19a   :  { %v262_v43 = vpop.permute.xlu1 %261  ;;  %837 = vmatpush3.msra.mxu1 %v288_v31  ;;  %v417_v29 = vrot.slane %v35_v28, %v181_v51 }
 0x19b   :  { %v281_v45 = vmul.f32 %v279_v2, %v262_v43  ;;  %838 = vmatprep.subr.mxu1 %v998_v0  ;;  %v480_v43 = vrot.slane %v35_v28, %v244_v55 }
 0x19c   :  { %839 = vmatpush3.msra.mxu1 %v287_v42 }
 0x19d   :  { %v286_v39 = vadd.f32 %v281_v45, %v252_v38  ;;  %840 = vmatprep.subr.mxu1 %v998_v0  ;;  %v514_v45 = vrot.slane %v35_v28, %v278_v57 }
 0x19e   :  { %v258_v46 = vpop.permute.xlu1 %257 }
 0x19f   :  { %v280_v40 = vmul.f32 %v279_v2, %v258_v46  ;;  %841 = vmatpush3.msra.mxu1 %v286_v39 }
 0x1a0   :  { %842 = vmatprep.subr.mxu1 %v998_v0 }
 0x1a1   :  { %v285_v36 = vadd.f32 %v280_v40, %v251_v48 }
 0x1a3   :  { %843 = vmatpush3.msra.mxu1 %v285_v36 }
 0x1a4   :  { %845 = vmatmul.mubr.msk.f32.vlgmr.msra.gmra.mxu1 %vm43_vm1, %v1026_v6  ;;  %884 = vmatprep.subr.mxu1 %v998_v0 }
 0x1a5   :  { %847 = vmatprep.mubr.msk.f32.mxu1 %vm999_vm0, %v998_v0 }
 0x1a8   :  { %848 = vmatmul.mubr.msk.f32.gmra.mxu1 %vm43_vm1, %v1034_v7 }
 0x1a9   :  { %850 = vmatprep.mubr.msk.f32.mxu1 %vm999_vm0, %v998_v0 }
 0x1ac   :  { %851 = vmatmul.mubr.msk.f32.gmra.mxu1 %vm43_vm1, %v1040_v8 }
 0x1ad   :  { %853 = vmatprep.mubr.msk.f32.mxu1 %vm999_vm0, %v998_v0 }
 0x1b0   :  { %854 = vmatmul.mubr.msk.f32.gmra.mxu1 %vm43_vm1, %v1046_v9 }
 0x1b1   :  { %856 = vmatprep.mubr.msk.f32.mxu1 %vm999_vm0, %v998_v0 }
 0x1b4   :  { %857 = vmatmul.mubr.msk.f32.gmra.mxu1 %vm43_vm1, %v1052_v10 }
 0x1b5   :  { %886 = vmatprep.mubr.msk.f32.mxu1 %vm999_vm0, %v998_v0 }
 0x264   :  { %v360_v52 = vpop.f32.mrf.mxu1 }
 0x265   :  { %v361_v53 = vadd.f32 %v754_v49, %v360_v52 }
 0x266   :  { %v846_v54 = vpop.f32.mrf.mxu1 }
 0x267   :  { %953 = vtanh.f32 %v361_v53 }
 0x268   :  { %v365_v56 = vpop.f32.mrf.mxu1 }
 0x269   :  { %v366_v58 = vadd.f32 %v754_v49, %v365_v56 }
 0x26a   :  { %v849_v59 = vpop.f32.mrf.mxu1 }
 0x26b   :  { %955 = vtanh.f32 %v366_v58 }
 0x26c   :  { %v370_v60 = vpop.f32.mrf.mxu1 }
 0x26d   :  { %v371_v61 = vadd.f32 %v754_v49, %v370_v60 }
 0x26e   :  { %v852_v62 = vpop.f32.mrf.mxu1 }
 0x26f   :  { %957 = vtanh.f32 %v371_v61 }
 0x270   :  { %v375_v63 = vpop.f32.mrf.mxu1 }
 0x271   :  { %v376_v2 = vadd.f32 %v754_v49, %v375_v63 }
 0x272   :  { %v855_v1 = vpop.f32.mrf.mxu1 }
 0x273   :  { %959 = vtanh.f32 %v376_v2 }
 0x274   :  { %v954_v3 = vpop.eup %953  ;;  %v380_v4 = vpop.f32.mrf.mxu1 }
 0x275   :  { %424 = vperm.xlu0 %928, %v954_v3   ;;  %391 = vperm.xlu1 %927, %v954_v3   ;;  %v381_v14 = vadd.f32 %v754_v49, %v380_v4 }
 0x276   :  { %v858_v5 = vpop.f32.mrf.mxu1 }
 0x277   :  { %961 = vtanh.f32 %v381_v14 }
 0x278   :  { %v956_v13 = vpop.eup %955 }
 0x279   :  { %396 = vperm.xlu1 %927, %v956_v13  }
 0x27c   :  { %v958_v15 = vpop.eup %957 }
 0x27d   :  { %929 = vset.pattern.permute.xlu1 %v1000_v11  ;;  %432 = vperm.xlu0 %928, %v958_v15  }
 0x27e   :  { %428 = vperm.xlu1 %929, %v956_v13  }
 0x280   :  { %v960_v16 = vpop.eup %959 }
 0x281   :  { %932 = vset.pattern.permute.xlu0 %v1002_v32 }
 0x282   :  { %930 = vset.pattern.permute.xlu1 %v1002_v32  ;;  %466 = vperm.xlu0 %932, %v958_v15  }
 0x283   :  { %462 = vperm.xlu1 %930, %v956_v13  }
 0x284   :  { %v962_v17 = vpop.eup %961 }
 0x286   :  { %933 = vset.pattern.permute.xlu0 %v1000_v11 }
 0x287   :  { %931 = vset.pattern.permute.xlu1 %v1001_v12  ;;  %436 = vperm.xlu0 %933, %v960_v16  }
 0x288   :  { %401 = vperm.xlu1 %931, %v958_v15  }
 0x28b   :  { %936 = vset.pattern.permute.xlu0 %v1001_v12  ;;  %v37_v12 = vld [vmem:[#allocation2 + $0x78] sm:$0x3] }
 0x28c   :  { %406 = vperm.xlu1 %931, %v960_v16   ;;  %411 = vperm.xlu0 %936, %v962_v17  }
 0x28d   :  { %885 = vmatpush3.msk.msra.mxu1 %vm644_vm2, %v37_v12 }
 0x290   :  { %934 = vset.pattern.permute.xlu1 %v1002_v32  ;;  %940 = vset.pattern.permute.xlu0 %v1003_v35 }
 0x291   :  { %470 = vperm.xlu1 %934, %v960_v16   ;;  %508 = vperm.xlu0 %940, %v962_v17  }
 0x295   :  { %935 = vset.pattern.permute.xlu1 %v1003_v35  ;;  %941 = vset.pattern.permute.xlu0 %v1002_v32 }
 0x296   :  { %504 = vperm.xlu1 %935, %v960_v16   ;;  %458 = vperm.xlu0 %941, %v954_v3  }
 0x29a   :  { %937 = vset.pattern.permute.xlu1 %v1000_v11  ;;  %942 = vset.pattern.permute.xlu0 %v1003_v35 }
 0x29b   :  { %440 = vperm.xlu1 %937, %v962_v17  }
 0x29f   :  { %938 = vset.pattern.permute.xlu1 %v1002_v32 }
 0x2a0   :  { %474 = vperm.xlu1 %938, %v962_v17  }
 0x2a4   :  { %939 = vset.pattern.permute.xlu1 %v1003_v35  ;;  %v446_v35 = vrot.slane %v35_v28, %v210_v50 }
 0x2a5   :  { %500 = vperm.xlu1 %939, %v958_v15  }
 0x2a9   :  { %496 = vperm.xlu1 %939, %v956_v13  }
 0x2ad   :  { %492 = vperm.xlu1 %939, %v954_v3  }
 0x2f0   :  { %v392_v18 = vpop.permute.xlu1 %391  ;;  %v425_v22 = vpop.permute.xlu0 %424 }
 0x2f1   :  { %v447_v63 = vmul.f32 %v446_v35, %v425_v22  ;;  %v418_v1 = vmul.f32 %v417_v29, %v392_v18 }
 0x2f3   :  { %v452_v15 = vadd.f32 %v447_v63, %v418_v1 }
 0x2f4   :  { %v397_v19 = vpop.permute.xlu1 %396 }
 0x2f5   :  { %v419_v59 = vmul.f32 %v417_v29, %v397_v19 }
 0x2f8   :  { %v433_v23 = vpop.permute.xlu0 %432 }
 0x2f9   :  { %v429_v20 = vpop.permute.xlu1 %428  ;;  %v449_v41 = vmul.f32 %v446_v35, %v433_v23 }
 0x2fa   :  { %v448_v53 = vmul.f32 %v446_v35, %v429_v20 }
 0x2fc   :  { %v453_v2 = vadd.f32 %v448_v53, %v419_v59 }
 0x2fd   :  { %v467_v25 = vpop.permute.xlu0 %466 }
 0x2fe   :  { %v463_v21 = vpop.permute.xlu1 %462  ;;  %v483_v54 = vmul.f32 %v480_v43, %v467_v25 }
 0x2ff   :  { %v482_v60 = vmul.f32 %v480_v43, %v463_v21 }
 0x301   :  { %v487_v5 = vadd.f32 %v482_v60, %v453_v2 }
 0x302   :  { %v437_v32 = vpop.permute.xlu0 %436 }
 0x303   :  { %v402_v11 = vpop.permute.xlu1 %401  ;;  %v450_v38 = vmul.f32 %v446_v35, %v437_v32 }
 0x304   :  { %v420_v42 = vmul.f32 %v417_v29, %v402_v11 }
 0x306   :  { %v454_v51 = vadd.f32 %v449_v41, %v420_v42 }
 0x307   :  { %v407_v24 = vpop.permute.xlu1 %406  ;;  %v412_v30 = vpop.permute.xlu0 %411 }
 0x308   :  { %v422_v33 = vmul.f32 %v417_v29, %v412_v30  ;;  %v421_v44 = vmul.f32 %v417_v29, %v407_v24  ;;  %v488_v61 = vadd.f32 %v483_v54, %v454_v51 }
 0x30a   :  { %v455_v40 = vadd.f32 %v450_v38, %v421_v44 }
 0x30c   :  { %v471_v26 = vpop.permute.xlu1 %470  ;;  %v509_v50 = vpop.permute.xlu0 %508 }
 0x30d   :  { %v484_v39 = vmul.f32 %v480_v43, %v471_v26  ;;  %v519_v36 = vmul.f32 %v514_v45, %v509_v50 }
 0x30f   :  { %v489_v56 = vadd.f32 %v484_v39, %v455_v40 }
 0x311   :  { %v505_v27 = vpop.permute.xlu1 %504  ;;  %v459_v62 = vpop.permute.xlu0 %458 }
 0x312   :  { %v518_v49 = vmul.f32 %v514_v45, %v505_v27  ;;  %v481_v13 = vmul.f32 %v480_v43, %v459_v62 }
 0x314   :  { %v523_v57 = vadd.f32 %v518_v49, %v489_v56  ;;  %v486_v12 = vadd.f32 %v481_v13, %v452_v15 }
 0x316   :  { %v441_v31 = vpop.permute.xlu1 %440 }
 0x317   :  { %v451_v34 = vmul.f32 %v446_v35, %v441_v31 }
 0x319   :  { %v456_v46 = vadd.f32 %v451_v34, %v422_v33  ;;  %v766_v34 = vld [vmem:[#allocation2 + $0x80] ss:$0 sm:$0xff] }
 0x31b   :  { %v475_v37 = vpop.permute.xlu1 %474 }
 0x31c   :  { %v485_v48 = vmul.f32 %v480_v43, %v475_v37 }
 0x31e   :  { %v490_v52 = vadd.f32 %v485_v48, %v456_v46 }
 0x320   :  { %v524_v58 = vadd.f32 %v519_v36, %v490_v52  ;;  %v501_v55 = vpop.permute.xlu1 %500 }
 0x321   :  { %v517_v47 = vmul.f32 %v514_v45, %v501_v55 }
 0x322   :  { %860 = vmatpush3.msra.mxu0 %v524_v58 }
 0x323   :  { %v522_v3 = vadd.f32 %v517_v47, %v488_v61  ;;  %861 = vmatprep.subr.mxu0 %v998_v0 }
 0x324   :  { %v497_v4 = vpop.permute.xlu1 %496  ;;  %862 = vmatpush3.msra.mxu0 %v523_v57 }
 0x325   :  { %v516_v14 = vmul.f32 %v514_v45, %v497_v4  ;;  %863 = vmatprep.subr.mxu0 %v998_v0 }
 0x326   :  { %864 = vmatpush3.msra.mxu0 %v522_v3 }
 0x327   :  { %v521_v16 = vadd.f32 %v516_v14, %v487_v5  ;;  %865 = vmatprep.subr.mxu0 %v998_v0 }
 0x328   :  { %v493_v17 = vpop.permute.xlu1 %492 }
 0x329   :  { %v515_v19 = vmul.f32 %v514_v45, %v493_v17  ;;  %866 = vmatpush3.msra.mxu0 %v521_v16 }
 0x32a   :  { %867 = vmatprep.subr.mxu0 %v998_v0 }
 0x32b   :  { %v520_v18 = vadd.f32 %v515_v19, %v486_v12 }
 0x32d   :  { %868 = vmatpush3.msra.mxu0 %v520_v18 }
 0x32e   :  { %870 = vmatmul.mubr.msk.f32.vlgmr.msra.gmra.mxu0 %vm43_vm1, %v1026_v6  ;;  %v760_v6 = vld [vmem:[#allocation2 + $0x70] ss:$0 sm:$0xff] }
 0x32f   :  { %872 = vmatprep.mubr.msk.f32.mxu0 %vm999_vm0, %v998_v0 }
 0x332   :  { %873 = vmatmul.mubr.msk.f32.gmra.mxu0 %vm43_vm1, %v1034_v7 }
 0x333   :  { %875 = vmatprep.mubr.msk.f32.mxu0 %vm999_vm0, %v998_v0 }
 0x336   :  { %876 = vmatmul.mubr.msk.f32.gmra.mxu0 %vm43_vm1, %v1040_v8 }
 0x337   :  { %878 = vmatprep.mubr.msk.f32.mxu0 %vm999_vm0, %v998_v0 }
 0x33a   :  { %879 = vmatmul.mubr.msk.f32.gmra.mxu0 %vm43_vm1, %v1046_v9 }
 0x33b   :  { %881 = vmatprep.mubr.msk.f32.mxu0 %vm999_vm0, %v998_v0 }
 0x33e   :  { %882 = vmatmul.mubr.msk.f32.gmra.mxu0 %vm43_vm1, %v1052_v10 }
 0x3ee   :  { %v595_v7 = vpop.f32.mrf.mxu0 }
 0x3ef   :  { %v596_v20 = vadd.f32 %v760_v6, %v595_v7 }
 0x3f0   :  { %v871_v21 = vpop.f32.mrf.mxu0 }
 0x3f1   :  { %963 = vtanh.f32 %v596_v20 }
 0x3f2   :  { %v600_v22 = vpop.f32.mrf.mxu0 }
 0x3f3   :  { %v601_v11 = vadd.f32 %v760_v6, %v600_v22 }
 0x3f4   :  { %v874_v8 = vpop.f32.mrf.mxu0 }
 0x3f5   :  { %965 = vtanh.f32 %v601_v11 }
 0x3f6   :  { %v605_v23 = vpop.f32.mrf.mxu0 }
 0x3f7   :  { %v606_v24 = vadd.f32 %v760_v6, %v605_v23 }
 0x3f8   :  { %v877_v25 = vpop.f32.mrf.mxu0 }
 0x3f9   :  { %967 = vtanh.f32 %v606_v24 }
 0x3fa   :  { %v610_v9 = vpop.f32.mrf.mxu0 }
 0x3fb   :  { %v611_v26 = vadd.f32 %v760_v6, %v610_v9 }
 0x3fc   :  { %v880_v32 = vpop.f32.mrf.mxu0 }
 0x3fd   :  { %969 = vtanh.f32 %v611_v26 }
 0x3fe   :  { %v964_v27 = vpop.eup %963  ;;  %v615_v10 = vpop.f32.mrf.mxu0 }
 0x3ff   :  { %v616_v28 = vadd.f32 %v760_v6, %v615_v10  ;;  %887 = vmatmul.mubr.msk.f32.vlgmr.msra.gmra.mxu1 %vm628_vm3, %v964_v27 }
 0x400   :  { %v883_v35 = vpop.f32.mrf.mxu0  ;;  %889 = vmatprep.mubr.msk.f32.mxu1 %vm999_vm0, %v998_v0 }
 0x401   :  { %971 = vtanh.f32 %v616_v28 }
 0x402   :  { %v966_v29 = vpop.eup %965 }
 0x403   :  { %890 = vmatmul.mubr.msk.f32.gmra.mxu1 %vm628_vm3, %v966_v29 }
 0x404   :  { %892 = vmatprep.mubr.msk.f32.mxu1 %vm999_vm0, %v998_v0 }
 0x406   :  { %v968_v30 = vpop.eup %967 }
 0x407   :  { %893 = vmatmul.mubr.msk.f32.gmra.mxu1 %vm628_vm3, %v968_v30 }
 0x408   :  { %895 = vmatprep.mubr.msk.f32.mxu1 %vm999_vm0, %v998_v0 }
 0x40a   :  { %v970_v31 = vpop.eup %969 }
 0x40b   :  { %896 = vmatmul.mubr.msk.f32.gmra.mxu1 %vm628_vm3, %v970_v31 }
 0x40c   :  { %898 = vmatprep.mubr.msk.f32.mxu1 %vm999_vm0, %v998_v0 }
 0x40e   :  { %v972_v33 = vpop.eup %971 }
 0x40f   :  { %899 = vmatmul.mubr.msk.f32.gmra.mxu1 %vm628_vm3, %v972_v33 }
 0x4bf   :  { %v714_v41 = vpop.f32.mrf.mxu1 }
 0x4c0   :  { %v715_v42 = vadd.f32 %v766_v34, %v714_v41 }
 0x4c1   :  { %v888_v43 = vpop.f32.mrf.mxu1 }
 0x4c2   :  { %738 = vst [vmem:[%s1189_s1] sm:$0xff] %v715_v42 }
 0x4c3   :  { %v719_v38 = vpop.f32.mrf.mxu1 }
 0x4c4   :  { %v720_v44 = vadd.f32 %v766_v34, %v719_v38 }
 0x4c5   :  { %v891_v45 = vpop.f32.mrf.mxu1 }
 0x4c6   :  { %739 = vst [vmem:[%s1189_s1 + $0x8] sm:$0xff] %v720_v44 }
 0x4c7   :  { %v724_v37 = vpop.f32.mrf.mxu1 }
 0x4c8   :  { %v725_v0 = vadd.f32 %v766_v34, %v724_v37 }
 0x4c9   :  { %v894_v39 = vpop.f32.mrf.mxu1 }
 0x4ca   :  { %740 = vst [vmem:[%s1189_s1 + $0x10] sm:$0xff] %v725_v0 }
 0x4cb   :  { %v729_v50 = vpop.f32.mrf.mxu1 }
 0x4cc   :  { %v730_v46 = vadd.f32 %v766_v34, %v729_v50 }
 0x4cd   :  { %v897_v48 = vpop.f32.mrf.mxu1 }
 0x4ce   :  { %741 = vst [vmem:[%s1189_s1 + $0x18] sm:$0xff] %v730_v46 }
 0x4cf   :  { %v734_v51 = vpop.f32.mrf.mxu1 }
 0x4d0   :  { %v735_v40 = vadd.f32 %v766_v34, %v734_v51 }
 0x4d1   :  { %v900_v36 = vpop.f32.mrf.mxu1 }
 0x4d2   :  { %742 = vst [vmem:[%s1189_s1 + $0x20] sm:$0xff] %v735_v40 }
 0x4d3   :  { %747 = vsyncpa [#allocation3], 1 }

</bundles_post_ra>
